<compile_context>
chip_gen: v5e
topology: v5e:2x2
jax: 0.10.0
libtpu: 0.0.40
codegen_flags: <defaults>
</compile_context>

<pallas_src>
import functools

import jax
import jax.numpy as jnp
from jax.experimental import pallas as pl
from jax.experimental.pallas import tpu as pltpu


def _round_up(x: int, m: int) -> int:
    return ((x + m - 1) // m) * m


def _make_value_mlp_kernel(n_hidden: int):
    """Builds the fused ValueMLP kernel for a given number of hidden blocks."""

    def kernel(x_ref, w_in_ref, b_in_ref, *rest):
        if n_hidden > 0:
            w_h_ref, b_h_ref, w_out_ref, b_out_ref, o_ref = rest
        else:
            w_out_ref, b_out_ref, o_ref = rest

        # Input layer: Linear(fp_dim, latent) + ReLU.  (Dropout = identity.)
        x = x_ref[...]                                        # (bt, fp_pad)
        h = jnp.dot(x, w_in_ref[...], preferred_element_type=jnp.float32)
        h = jnp.maximum(h + b_in_ref[...], 0.0)               # f32 (bt, lat_pad)

        # Hidden blocks: Linear(latent, latent) + ReLU (static unroll).
        for i in range(n_hidden):
            h = jnp.dot(h.astype(w_h_ref.dtype), w_h_ref[i],
                        preferred_element_type=jnp.float32)
            h = jnp.maximum(h + b_h_ref[i], 0.0)

        # Output layer: Linear(latent, 1).  A 1-column matmul wastes 127/128
        # MXU output lanes, so run it on the (otherwise idle) XLU + VPU:
        # transpose h once, multiply by the weight column, sublane-reduce.
        ht = jnp.transpose(h)                                 # (lat_pad, bt)
        y = jnp.sum(ht * w_out_ref[...], axis=0, keepdims=True)   # (1, bt)
        y = y + b_out_ref[0, 0]

        # Numerically stable softplus: log(1+exp(y)) = max(y,0)+log(1+exp(-|y|))
        sp = jnp.maximum(y, 0.0) + jnp.log(1.0 + jnp.exp(-jnp.abs(y)))
        o_ref[...] = sp.astype(o_ref.dtype)                   # lane-dense store

    return kernel


def value_mlp_forward(x, params, *, n_layers, batch_tile=None,
                      compute_dtype=None):
    """ValueMLP forward pass.  x: (B, fp_dim) -> (B, 1) float32.

    params = (w_in (fp,lat), b_in (lat,), w_h (n_hidden,lat,lat),
              b_h (n_hidden,lat), w_out (lat,1), b_out ()).
    compute_dtype: optionally stream x / weights in e.g. bf16 (f32 accumulate).
    """
    w_in, b_in, w_h, b_h, w_out, b_out = params
    B, fp_dim = x.shape
    latent_dim = w_in.shape[1]
    n_hidden = n_layers - 1

    if compute_dtype is not None:
        x = x.astype(compute_dtype)
        w_in = w_in.astype(compute_dtype)
        w_out = w_out.astype(compute_dtype)
        if n_hidden > 0:
            w_h = w_h.astype(compute_dtype)

    # Pad feature dims to the 128-lane width; pad batch to the tile size.
    fp_pad = _round_up(fp_dim, 128)
    lat_pad = _round_up(latent_dim, 128)
    if batch_tile is None:
        # ~512-row tiles stream well and fit comfortably in v7x's smaller VMEM.
        batch_tile = min(512, _round_up(B, 128))
    batch_tile = _round_up(batch_tile, 128)
    B_pad = _round_up(B, batch_tile)
    num_tiles = B_pad // batch_tile

    x_p = jnp.pad(x, ((0, B_pad - B), (0, fp_pad - fp_dim)))
    w_in_p = jnp.pad(w_in, ((0, fp_pad - fp_dim), (0, lat_pad - latent_dim)))
    b_in_p = jnp.pad(b_in.astype(jnp.float32),
                     (0, lat_pad - latent_dim)).reshape(1, lat_pad)
    w_out_p = jnp.pad(w_out, ((0, lat_pad - latent_dim), (0, 0)))
    b_out_p = jnp.asarray(b_out, jnp.float32).reshape(1, 1)

    in_specs = [
        pl.BlockSpec((batch_tile, fp_pad), lambda i: (i, 0)),   # streamed x
        pl.BlockSpec((fp_pad, lat_pad), lambda i: (0, 0)),      # resident W_in
        pl.BlockSpec((1, lat_pad), lambda i: (0, 0)),           # resident b_in
    ]
    args = [x_p, w_in_p, b_in_p]

    if n_hidden > 0:
        w_h_p = jnp.pad(w_h, ((0, 0), (0, lat_pad - latent_dim),
                              (0, lat_pad - latent_dim)))
        b_h_p = jnp.pad(b_h.astype(jnp.float32),
                        ((0, 0), (0, lat_pad - latent_dim)))
        b_h_p = b_h_p.reshape(n_hidden, 1, lat_pad)
        # NOTE: index_maps are constant -> Pallas only DMAs these once; for very
        # large latent dims a pipeline_mode=pl.Buffered(1) here would also halve
        # their VMEM footprint (not needed at these sizes).
        in_specs += [
            pl.BlockSpec((n_hidden, lat_pad, lat_pad), lambda i: (0, 0, 0)),
            pl.BlockSpec((n_hidden, 1, lat_pad), lambda i: (0, 0, 0)),
        ]
        args += [w_h_p, b_h_p]
        hidden_bytes = (w_h_p.size * w_h_p.dtype.itemsize +
                        b_h_p.size * b_h_p.dtype.itemsize)
    else:
        hidden_bytes = 0

    in_specs += [
        pl.BlockSpec((lat_pad, 1), lambda i: (0, 0)),           # resident w_out
        pl.BlockSpec(memory_space=pltpu.MemorySpace.SMEM),      # scalar b_out
    ]
    args += [w_out_p, b_out_p]

    # VMEM budget: double-buffered x / out tiles + resident weights + a few
    # f32 activation temporaries, with headroom.  Capped at 64 MiB (v7x).
    weight_bytes = (w_in_p.size * w_in_p.dtype.itemsize + b_in_p.size * 4 +
                    hidden_bytes + w_out_p.size * w_out_p.dtype.itemsize + 4)
    x_tile_bytes = batch_tile * fp_pad * x_p.dtype.itemsize
    out_tile_bytes = batch_tile * 4
    act_bytes = batch_tile * lat_pad * 4
    vmem_est = 2 * (x_tile_bytes + out_tile_bytes + weight_bytes) + 6 * act_bytes
    vmem_limit = int(min(max(vmem_est + (4 << 20), 16 << 20), 64 << 20))

    flops = 2 * B_pad * (fp_pad * lat_pad + n_hidden * lat_pad * lat_pad
                         + lat_pad)
    cost = pl.CostEstimate(
        flops=int(flops),
        transcendentals=int(2 * B_pad),                 # exp + log per output
        bytes_accessed=int(x_p.size * x_p.dtype.itemsize + weight_bytes
                           + B_pad * 4),
    )

    kernel = _make_value_mlp_kernel(n_hidden)

    out = pl.pallas_call(
        kernel,
        out_shape=jax.ShapeDtypeStruct((1, B_pad), jnp.float32),
        grid_spec=pltpu.PrefetchScalarGridSpec(
            num_scalar_prefetch=0,
            grid=(num_tiles,),
            in_specs=in_specs,
            # Lane-dense output: batch lives on the lane axis.
            out_specs=pl.BlockSpec((1, batch_tile), lambda i: (0, i)),
        ),
        compiler_params=pltpu.CompilerParams(
            dimension_semantics=("parallel",),
            vmem_limit_bytes=vmem_limit,
        ),
        cost_estimate=cost,
    )(*args)

    return out.reshape(B_pad, 1)[:B]


def init_params(key, n_layers, fp_dim, latent_dim):
    """Deterministic synthetic parameter init (shapes mirror nn.Linear)."""
    n_hidden = n_layers - 1
    ks = jax.random.split(key, 6)
    s_in = fp_dim ** -0.5
    s_h = latent_dim ** -0.5
    w_in = jax.random.uniform(ks[0], (fp_dim, latent_dim), jnp.float32,
                              -s_in, s_in)
    b_in = jax.random.uniform(ks[1], (latent_dim,), jnp.float32, -s_in, s_in)
    w_h = jax.random.uniform(ks[2], (n_hidden, latent_dim, latent_dim),
                             jnp.float32, -s_h, s_h)
    b_h = jax.random.uniform(ks[3], (n_hidden, latent_dim), jnp.float32,
                             -s_h, s_h)
    w_out = jax.random.uniform(ks[4], (latent_dim, 1), jnp.float32, -s_h, s_h)
    b_out = jax.random.uniform(ks[5], (), jnp.float32, -s_h, s_h)
    return (w_in, b_in, w_h, b_h, w_out, b_out)


def value_mlp_ref(x, params, *, n_layers):
    """Pure-JAX reference, literal transcription of the PyTorch forward."""
    w_in, b_in, w_h, b_h, w_out, b_out = params
    h = jnp.maximum(x @ w_in + b_in, 0.0)
    for i in range(n_layers - 1):
        h = jnp.maximum(h @ w_h[i] + b_h[i], 0.0)
    y = h @ w_out + b_out
    return jnp.log(1.0 + jnp.exp(y))


if __name__ == "__main__":
    root = jax.random.PRNGKey(0)
    k1, k2, k3, k4 = jax.random.split(root, 4)

    # Tolerances allow for XLA's default (reduced-precision) f32 matmul path in
    # the reference vs exact-f32 pieces inside the kernel.
    F32_TOL = dict(atol=2e-2, rtol=2e-2)

    # --- 1) small config, f32, single tile ---
    n_layers, fp_dim, latent_dim, batch = 2, 32, 32, 8
    x = jax.random.normal(k1, (batch, fp_dim), jnp.float32)
    params = init_params(k2, n_layers, fp_dim, latent_dim)

    out = jax.block_until_ready(value_mlp_forward(x, params, n_layers=n_layers))
    ref = value_mlp_ref(x, params, n_layers=n_layers)
    assert out.shape == (batch, 1), out.shape
    assert jnp.allclose(out, ref, **F32_TOL), float(jnp.max(jnp.abs(out - ref)))

    # --- 2) multi-tile grid (B not a multiple of the tile), deeper MLP, f32 ---
    n_layers2, fp_dim2, latent2, batch2 = 3, 48, 64, 300
    x2 = jax.random.normal(k3, (batch2, fp_dim2), jnp.float32)
    params2 = init_params(k4, n_layers2, fp_dim2, latent2)
    out2 = jax.block_until_ready(
        value_mlp_forward(x2, params2, n_layers=n_layers2, batch_tile=128))
    ref2 = value_mlp_ref(x2, params2, n_layers=n_layers2)
    assert out2.shape == (batch2, 1), out2.shape
    assert jnp.allclose(out2, ref2, **F32_TOL), \
        float(jnp.max(jnp.abs(out2 - ref2)))

    # --- 3) bf16 streaming of x / weights, f32 accumulation ---
    out_bf16 = jax.block_until_ready(
        value_mlp_forward(x, params, n_layers=n_layers,
                          compute_dtype=jnp.bfloat16))
    assert out_bf16.shape == (batch, 1), out_bf16.shape
    assert jnp.allclose(out_bf16, ref, atol=1e-1, rtol=1e-1), \
        float(jnp.max(jnp.abs(out_bf16 - ref)))

    # --- 4) n_layers == 1 (no hidden block; hidden slab is not even passed) ---
    params1 = init_params(k2, 1, fp_dim, latent_dim)
    out1 = jax.block_until_ready(value_mlp_forward(x, params1, n_layers=1))
    ref1 = value_mlp_ref(x, params1, n_layers=1)
    assert out1.shape == (batch, 1), out1.shape
    assert jnp.allclose(out1, ref1, **F32_TOL), \
        float(jnp.max(jnp.abs(out1 - ref1)))

    print("KERNEL_OK")
</pallas_src>

<mosaic_0001>
module attributes {stable_mosaic.version = 11 : i64} {
  func.func @kernel(%arg0: i32, %arg1: memref<128x128xf32, #tpu.memory_space<vmem>>, %arg2: memref<128x128xf32, #tpu.memory_space<vmem>>, %arg3: memref<1x128xf32, #tpu.memory_space<vmem>>, %arg4: memref<1x128x128xf32, #tpu.memory_space<vmem>>, %arg5: memref<1x1x128xf32, #tpu.memory_space<vmem>>, %arg6: memref<128x1xf32, #tpu.memory_space<vmem>>, %arg7: memref<1x1xf32, #tpu.memory_space<smem>>, %arg8: memref<1x128xf32, #tpu.memory_space<vmem>>) attributes {dimension_semantics = [#tpu.dimension_semantics<parallel>], iteration_bounds = array<i64: 1>, scalar_prefetch = 0 : i64, scratch_operands = 0 : i64, tpu.core_type = #tpu.core_type<tc>, window_params = [{transform_indices = @transform_0, window_bounds = array<i64: 128, 128>}, {pipeline_mode = #tpu.pipeline_mode<synchronous>, transform_indices = @transform_1, window_bounds = array<i64: 128, 128>}, {pipeline_mode = #tpu.pipeline_mode<synchronous>, transform_indices = @transform_2, window_bounds = array<i64: 1, 128>}, {pipeline_mode = #tpu.pipeline_mode<synchronous>, transform_indices = @transform_3, window_bounds = array<i64: 1, 128, 128>}, {pipeline_mode = #tpu.pipeline_mode<synchronous>, transform_indices = @transform_4, window_bounds = array<i64: 1, 1, 128>}, {pipeline_mode = #tpu.pipeline_mode<synchronous>, transform_indices = @transform_5, window_bounds = array<i64: 128, 1>}, {transform_indices = @transform_6, window_bounds = array<i64: 1, 1>}, {transform_indices = @transform_7, window_bounds = array<i64: 1, 128>}]} {
    %c0 = arith.constant 0 : index
    %c0_0 = arith.constant 0 : index
    %0 = vector.load %arg1[%c0, %c0_0] : memref<128x128xf32, #tpu.memory_space<vmem>>, vector<128x128xf32>
    %c0_1 = arith.constant 0 : index
    %c0_2 = arith.constant 0 : index
    %1 = vector.load %arg2[%c0_1, %c0_2] : memref<128x128xf32, #tpu.memory_space<vmem>>, vector<128x128xf32>
    %cst = arith.constant dense<0.000000e+00> : vector<128x128xf32>
    %2 = tpu.matmul %0, %1, %cst {dimension_numbers = #tpu.dot_dimension_numbers<[1], [0], [0], [1], [0, 0, 1, 1], [], []>} : vector<128x128xf32>, vector<128x128xf32>, vector<128x128xf32> -> vector<128x128xf32>
    %c0_3 = arith.constant 0 : index
    %c0_4 = arith.constant 0 : index
    %3 = vector.load %arg3[%c0_3, %c0_4] : memref<1x128xf32, #tpu.memory_space<vmem>>, vector<1x128xf32>
    %4 = vector.broadcast %3 : vector<1x128xf32> to vector<128x128xf32>
    %5 = arith.addf %2, %4 : vector<128x128xf32>
    %cst_5 = arith.constant 0.000000e+00 : f32
    %6 = vector.broadcast %cst_5 : f32 to vector<128x128xf32>
    %7 = arith.maximumf %5, %6 : vector<128x128xf32>
    %c0_6 = arith.constant 0 : index
    %c0_7 = arith.constant 0 : index
    %c0_8 = arith.constant 0 : index
    %8 = vector.load %arg4[%c0_6, %c0_7, %c0_8] : memref<1x128x128xf32, #tpu.memory_space<vmem>>, vector<1x128x128xf32>
    %9 = vector.shape_cast %8 : vector<1x128x128xf32> to vector<128x128xf32>
    %cst_9 = arith.constant dense<0.000000e+00> : vector<128x128xf32>
    %10 = tpu.matmul %7, %9, %cst_9 {dimension_numbers = #tpu.dot_dimension_numbers<[1], [0], [0], [1], [0, 0, 1, 1], [], []>} : vector<128x128xf32>, vector<128x128xf32>, vector<128x128xf32> -> vector<128x128xf32>
    %c0_10 = arith.constant 0 : index
    %c0_11 = arith.constant 0 : index
    %c0_12 = arith.constant 0 : index
    %11 = vector.load %arg5[%c0_10, %c0_11, %c0_12] : memref<1x1x128xf32, #tpu.memory_space<vmem>>, vector<1x1x128xf32>
    %12 = vector.shape_cast %11 : vector<1x1x128xf32> to vector<1x128xf32>
    %13 = vector.broadcast %12 : vector<1x128xf32> to vector<128x128xf32>
    %14 = arith.addf %10, %13 : vector<128x128xf32>
    %cst_13 = arith.constant 0.000000e+00 : f32
    %15 = vector.broadcast %cst_13 : f32 to vector<128x128xf32>
    %16 = arith.maximumf %14, %15 : vector<128x128xf32>
    %17 = tpu.transpose %16, [1, 0] : vector<128x128xf32> -> vector<128x128xf32>
    %c0_14 = arith.constant 0 : index
    %c0_15 = arith.constant 0 : index
    %18 = vector.load %arg6[%c0_14, %c0_15] : memref<128x1xf32, #tpu.memory_space<vmem>>, vector<128x1xf32>
    %19 = vector.broadcast %18 : vector<128x1xf32> to vector<128x128xf32>
    %20 = arith.mulf %17, %19 : vector<128x128xf32>
    %cst_16 = arith.constant dense<0.000000e+00> : vector<128xf32>
    %21 = vector.multi_reduction <add>, %20, %cst_16 [0] : vector<128x128xf32> to vector<128xf32>
    %22 = vector.shape_cast %21 : vector<128xf32> to vector<1x128xf32>
    %c0_17 = arith.constant 0 : index
    %c0_18 = arith.constant 0 : index
    %23 = memref.load %arg7[%c0_17, %c0_18] : memref<1x1xf32, #tpu.memory_space<smem>>
    %24 = vector.broadcast %23 : f32 to vector<1x128xf32>
    %25 = arith.addf %22, %24 : vector<1x128xf32>
    %cst_19 = arith.constant 0.000000e+00 : f32
    %26 = vector.broadcast %cst_19 : f32 to vector<1x128xf32>
    %27 = arith.maximumf %25, %26 : vector<1x128xf32>
    %28 = math.absf %25 : vector<1x128xf32>
    %cst_20 = arith.constant 0.000000e+00 : f32
    %29 = vector.broadcast %cst_20 : f32 to vector<1x128xf32>
    %30 = arith.subf %29, %28 : vector<1x128xf32>
    %31 = math.exp %30 : vector<1x128xf32>
    %cst_21 = arith.constant 1.000000e+00 : f32
    %32 = vector.broadcast %cst_21 : f32 to vector<1x128xf32>
    %33 = arith.addf %32, %31 : vector<1x128xf32>
    %34 = math.log %33 : vector<1x128xf32>
    %35 = arith.addf %27, %34 : vector<1x128xf32>
    %c0_22 = arith.constant 0 : index
    %c0_23 = arith.constant 0 : index
    %36 = vector.load %arg8[%c0_22, %c0_23] : memref<1x128xf32, #tpu.memory_space<vmem>>, vector<1x128xf32>
    tpu.vector_store %arg8[%c0_22, %c0_23], %35 {strides = array<i32>} : memref<1x128xf32, #tpu.memory_space<vmem>>, vector<1x128xf32>,
    return
  }
  func.func @transform_0(%arg0: i32) -> (i32, i32) {
    %c0_i32 = arith.constant 0 : i32
    %c0_i32_0 = arith.constant 0 : i32
    return %arg0, %c0_i32 : i32, i32
  }
  func.func @transform_1(%arg0: i32) -> (i32, i32) {
    %c0_i32 = arith.constant 0 : i32
    %c0_i32_0 = arith.constant 0 : i32
    %c0_i32_1 = arith.constant 0 : i32
    return %c0_i32, %c0_i32_0 : i32, i32
  }
  func.func @transform_2(%arg0: i32) -> (i32, i32) {
    %c0_i32 = arith.constant 0 : i32
    %c0_i32_0 = arith.constant 0 : i32
    %c0_i32_1 = arith.constant 0 : i32
    return %c0_i32, %c0_i32_0 : i32, i32
  }
  func.func @transform_3(%arg0: i32) -> (i32, i32, i32) {
    %c0_i32 = arith.constant 0 : i32
    %c0_i32_0 = arith.constant 0 : i32
    %c0_i32_1 = arith.constant 0 : i32
    %c0_i32_2 = arith.constant 0 : i32
    return %c0_i32, %c0_i32_0, %c0_i32_1 : i32, i32, i32
  }
  func.func @transform_4(%arg0: i32) -> (i32, i32, i32) {
    %c0_i32 = arith.constant 0 : i32
    %c0_i32_0 = arith.constant 0 : i32
    %c0_i32_1 = arith.constant 0 : i32
    %c0_i32_2 = arith.constant 0 : i32
    return %c0_i32, %c0_i32_0, %c0_i32_1 : i32, i32, i32
  }
  func.func @transform_5(%arg0: i32) -> (i32, i32) {
    %c0_i32 = arith.constant 0 : i32
    %c0_i32_0 = arith.constant 0 : i32
    %c0_i32_1 = arith.constant 0 : i32
    return %c0_i32, %c0_i32_0 : i32, i32
  }
  func.func @transform_6(%arg0: i32) -> (i32, i32) {
    %c0_i32 = arith.constant 0 : i32
    %c0_i32_0 = arith.constant 0 : i32
    %c0_i32_1 = arith.constant 0 : i32
    return %c0_i32, %c0_i32_0 : i32, i32
  }
  func.func @transform_7(%arg0: i32) -> (i32, i32) {
    %c0_i32 = arith.constant 0 : i32
    %c0_i32_0 = arith.constant 0 : i32
    return %c0_i32, %arg0 : i32, i32
  }
}

</mosaic_0001>

<bundles_post_ra>
// kernel: tpu_custom_call.1
= control target key start
LH: loop header
LB: loop body
LE: loop exit
PB: predicated region body
PF: predicated region fallthrough
CT: control target
= control target key end

     0   :  { %13 = vsyncpa [#allocation4], 0  ;;  %s780_s0 = inlined_call_operand.vmem [shape: f32[128,128], index: 0, kind: input, shape index: {}]   ;;  %s781_s1 = inlined_call_operand.hbm [shape: f32[128,128], index: 1, kind: input, shape index: {}]   ;;  %s782_s2 = inlined_call_operand.vmem [shape: f32[1,128], index: 2, kind: input, shape index: {}]   ;;  %s783_s3 = inlined_call_operand.hbm [shape: f32[1,128,128], index: 3, kind: input, shape index: {}]   ;;  %s784_s4 = inlined_call_operand.vmem [shape: f32[1,1,128], index: 4, kind: input, shape index: {}]   ;;  %s785_s5 = inlined_call_operand.vmem [shape: f32[128,1], index: 5, kind: input, shape index: {}]   ;;  %s786_s6 = inlined_call_operand.<no memory space> [shape: f32[1,1], index: 6, kind: input, shape index: {}]   ;;  %s787_s7 = inlined_call_operand.hbm [shape: f32[1,128], index: 7, kind: output, shape index: {}]  }
   0x1   :  { %14 = vsyncpa [#allocation7], 0 }
   0x2   :  { %15 = vsyncpa [#allocation5], 0  ;;  %s22_s26 = sshll.u32 %s781_s1, 4  ;;  %s599_s27 = smov [#allocation3]   ;;  %s23_s26 = int_to_ptr.hbm [resolvable:$true] %s22_s26 }
   0x3   :  { %s24_s28 = sshll.u32 %s599_s27, 4  ;;  %s37_s8 = sshll.u32 %s783_s3, 4  ;;  %s25_s28 = int_to_ptr.vmem [resolvable:$true] %s24_s28  ;;  %s38_s8 = int_to_ptr.hbm [resolvable:$true] %s37_s8 }
   0x4   :  { %s600_s9 = smov 128   ;;  %s601_s10 = smov 8  }
   0x5   :  { %30 = dma.hbm_to_vmem [thread:$0]  %s23_s26, 2048, %s25_s28, [#allocation4], %s600_s9, %s600_s9, %s601_s10  }
   0x6   :  { %s602_s11 = smov [#allocation6]  }
   0x7   :  { %s39_s12 = sshll.u32 %s602_s11, 4  ;;  %s40_s12 = int_to_ptr.vmem [resolvable:$true] %s39_s12 }
   0x8   :  { %45 = dma.hbm_to_vmem [thread:$0]  %s38_s8, 2048, %s40_s12, [#allocation7], %s600_s9, %s600_s9, %s601_s10  }
   0x9   :  { %593 = dma.done.wait [#allocation4], 2048  }
   0xa   :  { %594 = vsyncadd [#allocation4], 4294965248 }
   0xb   :  { %595 = dma.done.wait [#allocation7], 2048  }
   0xc   :  { %596 = vsyncadd [#allocation7], 4294965248  ;;  %v91_v0 = vld [vmem:[#allocation3 + $0x78] sm:$0xff]  ;;  %v90_v1 = vld [vmem:[#allocation3 + $0x70] sm:$0xff]  ;;  %s604_s24 = smov [#allocation8]   ;;  %s463_s28 = sshll.u32 %s787_s7, 4  ;;  %s464_s28 = int_to_ptr.hbm [resolvable:$true] %s463_s28 }
   0xd   :  { %96 = vmatpush.msra.mxu0 %v91_v0  ;;  %474 = vmatpush.msra.mxu2 %v91_v0  ;;  %v89_v2 = vld [vmem:[#allocation3 + $0x68] sm:$0xff]  ;;  %v88_v3 = vld [vmem:[#allocation3 + $0x60] sm:$0xff]  ;;  %v87_v4 = vld [vmem:[#allocation3 + $0x58] sm:$0xff]  ;;  %s461_s25 = sshll.u32 %s604_s24, 4  ;;  %s462_s25 = int_to_ptr.vmem [resolvable:$true] %s461_s25 }
   0xe   :  { %v86_v5 = vld [vmem:[#allocation3 + $0x50] sm:$0xff]  ;;  %v85_v6 = vld [vmem:[#allocation3 + $0x48] sm:$0xff]  ;;  %v84_v7 = vld [vmem:[#allocation3 + $0x40] sm:$0xff] }
   0xf   :  { %97 = vmatpush.msra.mxu0 %v90_v1  ;;  %475 = vmatpush.msra.mxu2 %v90_v1  ;;  %v83_v8 = vld [vmem:[#allocation3 + $0x38] sm:$0xff]  ;;  %v82_v9 = vld [vmem:[#allocation3 + $0x30] sm:$0xff]  ;;  %v81_v10 = vld [vmem:[#allocation3 + $0x28] sm:$0xff] }
  0x10   :  { %v80_v11 = vld [vmem:[#allocation3 + $0x20] sm:$0xff]  ;;  %v79_v12 = vld [vmem:[#allocation3 + $0x18] sm:$0xff]  ;;  %v78_v13 = vld [vmem:[#allocation3 + $0x10] sm:$0xff] }
  0x11   :  { %98 = vmatpush.msra.mxu0 %v89_v2  ;;  %476 = vmatpush.msra.mxu2 %v89_v2  ;;  %v77_v14 = vld [vmem:[#allocation3 + $0x8] sm:$0xff]  ;;  %v76_v15 = vld [vmem:[#allocation3] sm:$0xff]  ;;  %v62_v18 = vld [vmem:[%s780_s0 + $0x10] sm:$0xff] }
  0x12   :  { %v60_v16 = vld [vmem:[%s780_s0] sm:$0xff]  ;;  %v61_v17 = vld [vmem:[%s780_s0 + $0x8] sm:$0xff]  ;;  %v63_v20 = vld [vmem:[%s780_s0 + $0x18] sm:$0xff] }
  0x13   :  { %99 = vmatpush.msra.mxu0 %v88_v3  ;;  %477 = vmatpush.msra.mxu2 %v88_v3  ;;  %v68_v19 = vld [vmem:[%s780_s0 + $0x40] sm:$0xff]  ;;  %v69_v21 = vld [vmem:[%s780_s0 + $0x48] sm:$0xff]  ;;  %v192_v22 = vld [vmem:[#allocation6 + $0x78] sm:$0xff] }
  0x14   :  { %197 = vmatpush.msra.mxu1 %v192_v22  ;;  %490 = vmatpush.msra.mxu3 %v192_v22  ;;  %v64_v23 = vld [vmem:[%s780_s0 + $0x20] sm:$0xff]  ;;  %v70_v24 = vld [vmem:[%s780_s0 + $0x50] sm:$0xff]  ;;  %v190_v26 = vld [vmem:[#allocation6 + $0x68] sm:$0xff] }
  0x15   :  { %100 = vmatpush.msra.mxu0 %v87_v4  ;;  %478 = vmatpush.msra.mxu2 %v87_v4  ;;  %v191_v25 = vld [vmem:[#allocation6 + $0x70] sm:$0xff]  ;;  %v189_v27 = vld [vmem:[#allocation6 + $0x60] sm:$0xff]  ;;  %v65_v28 = vld [vmem:[%s780_s0 + $0x28] sm:$0xff] }
  0x16   :  { %198 = vmatpush.msra.mxu1 %v191_v25  ;;  %491 = vmatpush.msra.mxu3 %v191_v25  ;;  %v188_v29 = vld [vmem:[#allocation6 + $0x58] sm:$0xff]  ;;  %v187_v31 = vld [vmem:[#allocation6 + $0x50] sm:$0xff]  ;;  %v186_v32 = vld [vmem:[#allocation6 + $0x48] sm:$0xff] }
  0x17   :  { %101 = vmatpush.msra.mxu0 %v86_v5  ;;  %479 = vmatpush.msra.mxu2 %v86_v5  ;;  %v71_v30 = vld [vmem:[%s780_s0 + $0x58] sm:$0xff]  ;;  %v185_v33 = vld [vmem:[#allocation6 + $0x40] sm:$0xff]  ;;  %v66_v34 = vld [vmem:[%s780_s0 + $0x30] sm:$0xff] }
  0x18   :  { %199 = vmatpush.msra.mxu1 %v190_v26  ;;  %492 = vmatpush.msra.mxu3 %v190_v26  ;;  %v184_v35 = vld [vmem:[#allocation6 + $0x38] sm:$0xff]  ;;  %v72_v36 = vld [vmem:[%s780_s0 + $0x60] sm:$0xff]  ;;  %v183_v37 = vld [vmem:[#allocation6 + $0x30] sm:$0xff] }
  0x19   :  { %102 = vmatpush.msra.mxu0 %v85_v6  ;;  %480 = vmatpush.msra.mxu2 %v85_v6  ;;  %v182_v38 = vld [vmem:[#allocation6 + $0x28] sm:$0xff]  ;;  %v181_v39 = vld [vmem:[#allocation6 + $0x20] sm:$0xff]  ;;  %v67_v40 = vld [vmem:[%s780_s0 + $0x38] sm:$0xff] }
  0x1a   :  { %200 = vmatpush.msra.mxu1 %v189_v27  ;;  %493 = vmatpush.msra.mxu3 %v189_v27  ;;  %v180_v41 = vld [vmem:[#allocation6 + $0x18] sm:$0xff]  ;;  %v73_v42 = vld [vmem:[%s780_s0 + $0x68] sm:$0xff]  ;;  %v74_v43 = vld [vmem:[%s780_s0 + $0x70] sm:$0xff] }
  0x1b   :  { %103 = vmatpush.msra.mxu0 %v84_v7  ;;  %481 = vmatpush.msra.mxu2 %v84_v7  ;;  %v75_v44 = vld [vmem:[%s780_s0 + $0x78] sm:$0xff]  ;;  %v179_v45 = vld [vmem:[#allocation6 + $0x10] sm:$0xff]  ;;  %v178_v46 = vld [vmem:[#allocation6 + $0x8] sm:$0xff] }
  0x1c   :  { %201 = vmatpush.msra.mxu1 %v188_v29  ;;  %494 = vmatpush.msra.mxu3 %v188_v29  ;;  %v177_v47 = vld [vmem:[#allocation6] sm:$0xff] }
  0x1d   :  { %104 = vmatpush.msra.mxu0 %v83_v8  ;;  %482 = vmatpush.msra.mxu2 %v83_v8  ;;  %v515_v48 = vld [vmem:[%s782_s2] ss:$0 sm:$0xff] }
  0x1e   :  { %202 = vmatpush.msra.mxu1 %v187_v31  ;;  %495 = vmatpush.msra.mxu3 %v187_v31 }
  0x1f   :  { %105 = vmatpush.msra.mxu0 %v82_v9  ;;  %483 = vmatpush.msra.mxu2 %v82_v9 }
  0x20   :  { %203 = vmatpush.msra.mxu1 %v186_v32  ;;  %496 = vmatpush.msra.mxu3 %v186_v32 }
  0x21   :  { %106 = vmatpush.msra.mxu0 %v81_v10  ;;  %484 = vmatpush.msra.mxu2 %v81_v10 }
  0x22   :  { %204 = vmatpush.msra.mxu1 %v185_v33  ;;  %497 = vmatpush.msra.mxu3 %v185_v33  ;;  %v705_v33 = vld [vmem:[%s784_s4] ss:$0 sm:$0xff] }
  0x23   :  { %107 = vmatpush.msra.mxu0 %v80_v11  ;;  %485 = vmatpush.msra.mxu2 %v80_v11 }
  0x24   :  { %205 = vmatpush.msra.mxu1 %v184_v35  ;;  %498 = vmatpush.msra.mxu3 %v184_v35 }
  0x25   :  { %108 = vmatpush.msra.mxu0 %v79_v12  ;;  %486 = vmatpush.msra.mxu2 %v79_v12 }
  0x26   :  { %206 = vmatpush.msra.mxu1 %v183_v37  ;;  %499 = vmatpush.msra.mxu3 %v183_v37 }
  0x27   :  { %109 = vmatpush.msra.mxu0 %v78_v13  ;;  %487 = vmatpush.msra.mxu2 %v78_v13 }
  0x28   :  { %207 = vmatpush.msra.mxu1 %v182_v38  ;;  %500 = vmatpush.msra.mxu3 %v182_v38 }
  0x29   :  { %110 = vmatpush.msra.mxu0 %v77_v14  ;;  %488 = vmatpush.msra.mxu2 %v77_v14 }
  0x2a   :  { %208 = vmatpush.msra.mxu1 %v181_v39  ;;  %501 = vmatpush.msra.mxu3 %v181_v39 }
  0x2b   :  { %111 = vmatpush.msra.mxu0 %v76_v15  ;;  %489 = vmatpush.msra.mxu2 %v76_v15 }
  0x2c   :  { %112 = vmatmul.f32.vlgmr.msra.gmra.mxu0 %v60_v16  ;;  %136 = vmatmul.f32.vlgmr.msra.gmra.mxu2 %v68_v19 }
  0x2d   :  { %209 = vmatpush.msra.mxu1 %v180_v41  ;;  %502 = vmatpush.msra.mxu3 %v180_v41 }
  0x2f   :  { %210 = vmatpush.msra.mxu1 %v179_v45  ;;  %503 = vmatpush.msra.mxu3 %v179_v45 }
  0x31   :  { %211 = vmatpush.msra.mxu1 %v178_v46  ;;  %504 = vmatpush.msra.mxu3 %v178_v46 }
  0x33   :  { %212 = vmatpush.msra.mxu1 %v177_v47  ;;  %505 = vmatpush.msra.mxu3 %v177_v47 }
  0x34   :  { %115 = vmatmul.f32.gmra.mxu0 %v61_v17  ;;  %139 = vmatmul.f32.gmra.mxu2 %v69_v21 }
  0x3c   :  { %118 = vmatmul.f32.gmra.mxu0 %v62_v18  ;;  %142 = vmatmul.f32.gmra.mxu2 %v70_v24 }
  0x44   :  { %121 = vmatmul.f32.gmra.mxu0 %v63_v20  ;;  %145 = vmatmul.f32.gmra.mxu2 %v71_v30 }
  0x4c   :  { %124 = vmatmul.f32.gmra.mxu0 %v64_v23  ;;  %148 = vmatmul.f32.gmra.mxu2 %v72_v36 }
  0x54   :  { %127 = vmatmul.f32.gmra.mxu0 %v65_v28  ;;  %151 = vmatmul.f32.gmra.mxu2 %v73_v42 }
  0x5c   :  { %130 = vmatmul.f32.gmra.mxu0 %v66_v34  ;;  %154 = vmatmul.f32.gmra.mxu2 %v74_v43  ;;  %v310_v43 = vld [vmem:[%s785_s5] sm:$0xff] }
  0x64   :  { %133 = vmatmul.f32.gmra.mxu0 %v67_v40  ;;  %157 = vmatmul.f32.gmra.mxu2 %v75_v44  ;;  %v603_v44 = vmov 0  }
  0x65   :  { %512 = vset.pattern.permute.xlu1 %v603_v44  ;;  %513 = vset.pattern.permute.xlu2 %v603_v44 }
  0x66   :  { %328 = vperm.xlu1 %512, %v310_v43  }
  0xa9   :  { %v113_v49 = vpop.f32.mrf.mxu0 }
  0xaa   :  { %v114_v50 = vadd.f32 %v515_v48, %v113_v49 }
  0xac   :  { %v161_v51 = vmax.f32 %v114_v50, 0.0 }
  0xae   :  { %213 = vmatmul.f32.vlgmr.msra.gmra.mxu1 %v161_v51 }
  0xaf   :  { %v137_v60 = vpop.f32.mrf.mxu2 }
  0xb0   :  { %v138_v62 = vadd.f32 %v515_v48, %v137_v60 }
  0xb1   :  { %v116_v52 = vpop.f32.mrf.mxu0 }
  0xb2   :  { %v117_v53 = vadd.f32 %v515_v48, %v116_v52  ;;  %v169_v63 = vmax.f32 %v138_v62, 0.0  ;;  %v314_v52 = vld [vmem:[%s785_s5 + $0x20] sm:$0xff] }
  0xb3   :  { %v318_v62 = vld [vmem:[%s785_s5 + $0x40] sm:$0xff] }
  0xb4   :  { %v162_v54 = vmax.f32 %v117_v53, 0.0  ;;  %237 = vmatmul.f32.vlgmr.msra.gmra.mxu3 %v169_v63 }
  0xb6   :  { %216 = vmatmul.f32.gmra.mxu1 %v162_v54 }
  0xb7   :  { %v140_v2 = vpop.f32.mrf.mxu2 }
  0xb8   :  { %v141_v4 = vadd.f32 %v515_v48, %v140_v2 }
  0xb9   :  { %v119_v55 = vpop.f32.mrf.mxu0 }
  0xba   :  { %v120_v56 = vadd.f32 %v515_v48, %v119_v55  ;;  %v170_v5 = vmax.f32 %v141_v4, 0.0  ;;  %v313_v4 = vld [vmem:[%s785_s5 + $0x18] sm:$0xff] }
  0xbc   :  { %v163_v57 = vmax.f32 %v120_v56, 0.0  ;;  %240 = vmatmul.f32.gmra.mxu3 %v170_v5  ;;  %v320_v5 = vld [vmem:[%s785_s5 + $0x50] sm:$0xff] }
  0xbe   :  { %219 = vmatmul.f32.gmra.mxu1 %v163_v57  ;;  %v316_v57 = vld [vmem:[%s785_s5 + $0x30] sm:$0xff] }
  0xbf   :  { %v143_v8 = vpop.f32.mrf.mxu2 }
  0xc0   :  { %v144_v10 = vadd.f32 %v515_v48, %v143_v8 }
  0xc1   :  { %v122_v58 = vpop.f32.mrf.mxu0 }
  0xc2   :  { %v123_v59 = vadd.f32 %v515_v48, %v122_v58  ;;  %v171_v11 = vmax.f32 %v144_v10, 0.0  ;;  %v322_v10 = vld [vmem:[%s785_s5 + $0x60] sm:$0xff] }
  0xc4   :  { %v164_v61 = vmax.f32 %v123_v59, 0.0  ;;  %243 = vmatmul.f32.gmra.mxu3 %v171_v11 }
  0xc6   :  { %222 = vmatmul.f32.gmra.mxu1 %v164_v61  ;;  %v312_v61 = vld [vmem:[%s785_s5 + $0x10] sm:$0xff] }
  0xc7   :  { %v146_v14 = vpop.f32.mrf.mxu2  ;;  %338 = vperm.xlu2 %513, %v312_v61  }
  0xc8   :  { %v147_v16 = vadd.f32 %v515_v48, %v146_v14  ;;  %v317_v14 = vld [vmem:[%s785_s5 + $0x38] sm:$0xff] }
  0xc9   :  { %v125_v0 = vpop.f32.mrf.mxu0 }
  0xca   :  { %v126_v1 = vadd.f32 %v515_v48, %v125_v0  ;;  %v172_v17 = vmax.f32 %v147_v16, 0.0 }
  0xcc   :  { %v165_v3 = vmax.f32 %v126_v1, 0.0  ;;  %246 = vmatmul.f32.gmra.mxu3 %v172_v17 }
  0xce   :  { %225 = vmatmul.f32.gmra.mxu1 %v165_v3 }
  0xcf   :  { %v149_v20 = vpop.f32.mrf.mxu2  ;;  %343 = vperm.xlu2 %513, %v313_v4  }
  0xd0   :  { %v150_v22 = vadd.f32 %v515_v48, %v149_v20 }
  0xd1   :  { %v128_v6 = vpop.f32.mrf.mxu0 }
  0xd2   :  { %v129_v7 = vadd.f32 %v515_v48, %v128_v6  ;;  %v173_v23 = vmax.f32 %v150_v22, 0.0  ;;  %v321_v22 = vld [vmem:[%s785_s5 + $0x58] sm:$0xff] }
  0xd4   :  { %v166_v9 = vmax.f32 %v129_v7, 0.0  ;;  %249 = vmatmul.f32.gmra.mxu3 %v173_v23 }
  0xd6   :  { %228 = vmatmul.f32.gmra.mxu1 %v166_v9  ;;  %v315_v9 = vld [vmem:[%s785_s5 + $0x28] sm:$0xff] }
  0xd7   :  { %v152_v24 = vpop.f32.mrf.mxu2  ;;  %353 = vperm.xlu2 %513, %v315_v9  }
  0xd8   :  { %v153_v25 = vadd.f32 %v515_v48, %v152_v24 }
  0xd9   :  { %v131_v12 = vpop.f32.mrf.mxu0 }
  0xda   :  { %v132_v13 = vadd.f32 %v515_v48, %v131_v12  ;;  %v174_v26 = vmax.f32 %v153_v25, 0.0  ;;  %v323_v25 = vld [vmem:[%s785_s5 + $0x68] sm:$0xff] }
  0xdc   :  { %v167_v15 = vmax.f32 %v132_v13, 0.0  ;;  %252 = vmatmul.f32.gmra.mxu3 %v174_v26 }
  0xde   :  { %231 = vmatmul.f32.gmra.mxu1 %v167_v15  ;;  %v324_v15 = vld [vmem:[%s785_s5 + $0x70] sm:$0xff] }
  0xdf   :  { %v155_v27 = vpop.f32.mrf.mxu2  ;;  %363 = vperm.xlu2 %513, %v317_v14  }
  0xe0   :  { %v156_v28 = vadd.f32 %v515_v48, %v155_v27 }
  0xe1   :  { %v134_v18 = vpop.f32.mrf.mxu0 }
  0xe2   :  { %v135_v19 = vadd.f32 %v515_v48, %v134_v18  ;;  %v175_v29 = vmax.f32 %v156_v28, 0.0 }
  0xe4   :  { %v168_v21 = vmax.f32 %v135_v19, 0.0  ;;  %255 = vmatmul.f32.gmra.mxu3 %v175_v29  ;;  %v319_v19 = vld [vmem:[%s785_s5 + $0x48] sm:$0xff]  ;;  %v325_v29 = vld [vmem:[%s785_s5 + $0x78] sm:$0xff] }
  0xe6   :  { %234 = vmatmul.f32.gmra.mxu1 %v168_v21 }
  0xe7   :  { %v158_v30 = vpop.f32.mrf.mxu2  ;;  %373 = vperm.xlu2 %513, %v319_v19  }
  0xe8   :  { %v159_v31 = vadd.f32 %v515_v48, %v158_v30  ;;  %v311_v48 = vld [vmem:[%s785_s5 + $0x8] sm:$0xff] }
  0xe9   :  { %333 = vperm.xlu1 %512, %v311_v48  }
  0xea   :  { %v176_v32 = vmax.f32 %v159_v31, 0.0 }
  0xec   :  { %258 = vmatmul.f32.gmra.mxu3 %v176_v32 }
  0xef   :  { %383 = vperm.xlu2 %513, %v321_v22  }
  0xf1   :  { %348 = vperm.xlu1 %512, %v314_v52  }
  0xf7   :  { %393 = vperm.xlu2 %513, %v323_v25  }
  0xf9   :  { %358 = vperm.xlu1 %512, %v316_v57  }
  0xff   :  { %403 = vperm.xlu2 %513, %v325_v29  }
 0x101   :  { %368 = vperm.xlu1 %512, %v318_v62  }
 0x109   :  { %378 = vperm.xlu1 %512, %v320_v5  }
 0x111   :  { %388 = vperm.xlu1 %512, %v322_v10  }
 0x119   :  { %398 = vperm.xlu1 %512, %v324_v15  }
 0x121   :  { %v339_v43 = vpop.permute.xlu2 %338 }
 0x129   :  { %v344_v48 = vpop.permute.xlu2 %343 }
 0x12b   :  { %v214_v34 = vpop.f32.mrf.mxu1 }
 0x12c   :  { %v215_v35 = vadd.f32 %v705_v33, %v214_v34 }
 0x12e   :  { %v262_v36 = vmax.f32 %v215_v35, 0.0 }
 0x130   :  { %278 = vxpose.xlu0.b32.start [1/16] %v262_v36, 128  ;;  %v329_v36 = vpop.permute.xlu1 %328 }
 0x133   :  { %v217_v37 = vpop.f32.mrf.mxu1 }
 0x134   :  { %v218_v38 = vadd.f32 %v705_v33, %v217_v37 }
 0x136   :  { %v263_v39 = vmax.f32 %v218_v38, 0.0 }
 0x137   :  { %v238_v56 = vpop.f32.mrf.mxu3 }
 0x138   :  { %279 = vxpose.xlu0.b32.cont [2/16] %v263_v39, 128  ;;  %v239_v3 = vadd.f32 %v705_v33, %v238_v56 }
 0x13a   :  { %v270_v7 = vmax.f32 %v239_v3, 0.0 }
 0x13b   :  { %v220_v40 = vpop.f32.mrf.mxu1 }
 0x13c   :  { %v221_v41 = vadd.f32 %v705_v33, %v220_v40 }
 0x13e   :  { %v264_v42 = vmax.f32 %v221_v41, 0.0 }
 0x13f   :  { %v241_v63 = vpop.f32.mrf.mxu3 }
 0x140   :  { %280 = vxpose.xlu0.b32.cont [3/16] %v264_v42, 128  ;;  %v242_v8 = vadd.f32 %v705_v33, %v241_v63 }
 0x142   :  { %v271_v11 = vmax.f32 %v242_v8, 0.0 }
 0x143   :  { %v223_v45 = vpop.f32.mrf.mxu1 }
 0x144   :  { %v224_v46 = vadd.f32 %v705_v33, %v223_v45 }
 0x146   :  { %v265_v47 = vmax.f32 %v224_v46, 0.0 }
 0x147   :  { %v244_v6 = vpop.f32.mrf.mxu3 }
 0x148   :  { %281 = vxpose.xlu0.b32.cont [4/16] %v265_v47, 128  ;;  %v245_v13 = vadd.f32 %v705_v33, %v244_v6 }
 0x14a   :  { %v272_v16 = vmax.f32 %v245_v13, 0.0 }
 0x14b   :  { %v226_v49 = vpop.f32.mrf.mxu1 }
 0x14c   :  { %v227_v50 = vadd.f32 %v705_v33, %v226_v49 }
 0x14e   :  { %v266_v51 = vmax.f32 %v227_v50, 0.0 }
 0x14f   :  { %v247_v12 = vpop.f32.mrf.mxu3 }
 0x150   :  { %282 = vxpose.xlu0.b32.cont [5/16] %v266_v51, 128  ;;  %v248_v18 = vadd.f32 %v705_v33, %v247_v12 }
 0x152   :  { %v273_v20 = vmax.f32 %v248_v18, 0.0 }
 0x153   :  { %v229_v53 = vpop.f32.mrf.mxu1 }
 0x154   :  { %v230_v54 = vadd.f32 %v705_v33, %v229_v53 }
 0x156   :  { %v267_v55 = vmax.f32 %v230_v54, 0.0 }
 0x157   :  { %v250_v17 = vpop.f32.mrf.mxu3 }
 0x158   :  { %283 = vxpose.xlu0.b32.cont [6/16] %v267_v55, 128  ;;  %v251_v21 = vadd.f32 %v705_v33, %v250_v17 }
 0x15a   :  { %v274_v24 = vmax.f32 %v251_v21, 0.0 }
 0x15b   :  { %v232_v58 = vpop.f32.mrf.mxu1  ;;  %v334_v38 = vpop.permute.xlu1 %333 }
 0x15c   :  { %v233_v59 = vadd.f32 %v705_v33, %v232_v58 }
 0x15e   :  { %v268_v60 = vmax.f32 %v233_v59, 0.0  ;;  %v354_v59 = vpop.permute.xlu2 %353 }
 0x15f   :  { %v253_v23 = vpop.f32.mrf.mxu3 }
 0x160   :  { %284 = vxpose.xlu0.b32.cont [7/16] %v268_v60, 128  ;;  %v254_v26 = vadd.f32 %v705_v33, %v253_v23 }
 0x162   :  { %v275_v28 = vmax.f32 %v254_v26, 0.0 }
 0x163   :  { %v235_v0 = vpop.f32.mrf.mxu1  ;;  %v349_v52 = vpop.permute.xlu1 %348 }
 0x164   :  { %v236_v1 = vadd.f32 %v705_v33, %v235_v0 }
 0x166   :  { %v269_v2 = vmax.f32 %v236_v1, 0.0  ;;  %v364_v62 = vpop.permute.xlu2 %363 }
 0x167   :  { %v256_v27 = vpop.f32.mrf.mxu3 }
 0x168   :  { %285 = vxpose.xlu0.b32.cont [8/16] %v269_v2, 128  ;;  %v257_v30 = vadd.f32 %v705_v33, %v256_v27 }
 0x16a   :  { %v276_v31 = vmax.f32 %v257_v30, 0.0 }
 0x16b   :  { %v359_v61 = vpop.permute.xlu1 %358 }
 0x16e   :  { %v374_v2 = vpop.permute.xlu2 %373 }
 0x16f   :  { %v259_v32 = vpop.f32.mrf.mxu3 }
 0x170   :  { %286 = vxpose.xlu0.b32.cont [9/16] %v270_v7, 128  ;;  %v260_v34 = vadd.f32 %v705_v33, %v259_v32 }
 0x172   :  { %v277_v35 = vmax.f32 %v260_v34, 0.0 }
 0x173   :  { %v369_v0 = vpop.permute.xlu1 %368 }
 0x176   :  { %v384_v6 = vpop.permute.xlu2 %383 }
 0x178   :  { %287 = vxpose.xlu0.b32.cont [10/16] %v271_v11, 128 }
 0x17b   :  { %v379_v3 = vpop.permute.xlu1 %378 }
 0x17e   :  { %v394_v17 = vpop.permute.xlu2 %393 }
 0x180   :  { %288 = vxpose.xlu0.b32.cont [11/16] %v272_v16, 128 }
 0x186   :  { %v404_v29 = vpop.permute.xlu2 %403 }
 0x188   :  { %289 = vxpose.xlu0.b32.cont [12/16] %v273_v20, 128 }
 0x190   :  { %290 = vxpose.xlu0.b32.cont [13/16] %v274_v24, 128 }
 0x198   :  { %291 = vxpose.xlu0.b32.cont [14/16] %v275_v28, 128 }
 0x1a0   :  { %292 = vxpose.xlu0.b32.cont [15/16] %v276_v31, 128 }
 0x1a8   :  { %293 = vxpose.xlu0.b32.end [16/16] %v277_v35, 128 }
 0x1d4   :  { %v294_v37 = vpop.trf.xlu0 }
 0x1d5   :  { %v406_v40 = vmul.f32 %v329_v36, %v294_v37 }
 0x1dc   :  { %v295_v39 = vpop.trf.xlu0 }
 0x1dd   :  { %v407_v41 = vmul.f32 %v334_v38, %v295_v39 }
 0x1df   :  { %v422_v42 = vadd.f32 %v407_v41, %v406_v40  ;;  %v444_v40 = vstv %s786_s6 }
 0x1e4   :  { %v296_v45 = vpop.trf.xlu0 }
 0x1e5   :  { %v408_v46 = vmul.f32 %v339_v43, %v296_v45 }
 0x1e7   :  { %v423_v47 = vadd.f32 %v422_v42, %v408_v46 }
 0x1ec   :  { %v297_v49 = vpop.trf.xlu0 }
 0x1ed   :  { %v409_v50 = vmul.f32 %v344_v48, %v297_v49 }
 0x1ef   :  { %v424_v51 = vadd.f32 %v423_v47, %v409_v50 }
 0x1f4   :  { %v298_v53 = vpop.trf.xlu0 }
 0x1f5   :  { %v410_v33 = vmul.f32 %v349_v52, %v298_v53 }
 0x1f7   :  { %v425_v54 = vadd.f32 %v424_v51, %v410_v33 }
 0x1fc   :  { %v299_v55 = vpop.trf.xlu0 }
 0x1fd   :  { %v411_v5 = vmul.f32 %v354_v59, %v299_v55 }
 0x1ff   :  { %v426_v8 = vadd.f32 %v425_v54, %v411_v5 }
 0x204   :  { %v300_v56 = vpop.trf.xlu0 }
 0x205   :  { %v412_v7 = vmul.f32 %v359_v61, %v300_v56 }
 0x207   :  { %v427_v11 = vadd.f32 %v426_v8, %v412_v7 }
 0x20c   :  { %v301_v57 = vpop.trf.xlu0 }
 0x20d   :  { %v413_v9 = vmul.f32 %v364_v62, %v301_v57 }
 0x20f   :  { %514 = vset.pattern.permute.xlu0 %v603_v44  ;;  %v389_v44 = vpop.permute.xlu1 %388  ;;  %v428_v13 = vadd.f32 %v427_v11, %v413_v9 }
 0x214   :  { %v302_v58 = vpop.trf.xlu0 }
 0x215   :  { %v414_v12 = vmul.f32 %v369_v0, %v302_v58 }
 0x217   :  { %v429_v15 = vadd.f32 %v428_v13, %v414_v12  ;;  %v399_v25 = vpop.permute.xlu1 %398 }
 0x21c   :  { %v303_v60 = vpop.trf.xlu0 }
 0x21d   :  { %v415_v14 = vmul.f32 %v374_v2, %v303_v60 }
 0x21f   :  { %v430_v18 = vadd.f32 %v429_v15, %v415_v14 }
 0x224   :  { %v304_v63 = vpop.trf.xlu0 }
 0x225   :  { %v416_v16 = vmul.f32 %v379_v3, %v304_v63 }
 0x227   :  { %v431_v21 = vadd.f32 %v430_v18, %v416_v16 }
 0x22c   :  { %v305_v1 = vpop.trf.xlu0 }
 0x22d   :  { %v417_v19 = vmul.f32 %v384_v6, %v305_v1 }
 0x22f   :  { %v432_v23 = vadd.f32 %v431_v21, %v417_v19 }
 0x234   :  { %v306_v4 = vpop.trf.xlu0 }
 0x235   :  { %v418_v22 = vmul.f32 %v389_v44, %v306_v4 }
 0x237   :  { %v433_v26 = vadd.f32 %v432_v23, %v418_v22 }
 0x23c   :  { %v307_v10 = vpop.trf.xlu0 }
 0x23d   :  { %v419_v24 = vmul.f32 %v394_v17, %v307_v10 }
 0x23f   :  { %v434_v28 = vadd.f32 %v433_v26, %v419_v24 }
 0x244   :  { %v308_v20 = vpop.trf.xlu0 }
 0x245   :  { %v420_v27 = vmul.f32 %v399_v25, %v308_v20 }
 0x247   :  { %v435_v31 = vadd.f32 %v434_v28, %v420_v27 }
 0x24c   :  { %v309_v30 = vpop.trf.xlu0 }
 0x24d   :  { %v421_v32 = vmul.f32 %v404_v29, %v309_v30 }
 0x24f   :  { %v436_v34 = vadd.f32 %v435_v31, %v421_v32 }
 0x251   :  { %v437_v35 = vrot.slane %v436_v34, 4 }
 0x253   :  { %v438_v36 = vadd.f32 %v437_v35, %v436_v34 }
 0x255   :  { %v439_v37 = vrot.slane %v438_v36, 2 }
 0x257   :  { %v440_v38 = vadd.f32 %v439_v37, %v438_v36 }
 0x259   :  { %v441_v39 = vrot.slane %v440_v38, 1 }
 0x25b   :  { %v442_v41 = vadd.f32 %v441_v39, %v440_v38 }
 0x25d   :  { %v445_v42 = vadd.f32 %v444_v40, %v442_v41 }
 0x25f   :  { %v447_v43 = vand.u32 2147483647, %v445_v42  ;;  %v446_v50 = vmax.f32 %v445_v42, 0.0 }
 0x261   :  { %v448_v45 = vsub.f32 0.0, %v447_v43 }
 0x263   :  { %v449_v46 = vmul.f32 1.442695, %v448_v45 }
 0x265   :  { %517 = vpow2.f32 %v449_v46 }
 0x26b   :  { %v518_v47 = vpop.eup %517 }
 0x26c   :  { %v451_v48 = vadd.f32 1.0, %v518_v47 }
 0x26e   :  { %519 = vlog2.f32 %v451_v48 }
 0x274   :  { %v520_v49 = vpop.eup %519 }
 0x275   :  { %v453_v51 = vmul.f32 0.6931472, %v520_v49 }
 0x277   :  { %v454_v52 = vadd.f32 %v453_v51, %v446_v50 }
 0x279   :  { %455 = vst [vmem:[#allocation8] sm:$0x1] %v454_v52 }
 0x27a   :  { %466 = dma.vmem_to_hbm [thread:$0]  %s462_s25, 16, %s464_s28, [#allocation5]  }
 0x27b   :  { %597 = dma.done.wait [#allocation5], 16  }
 0x27c   :  { %598 = vsyncadd [#allocation5], 4294967280 }
 0x27d   :  { %471 = vsyncpa [#allocation4], 1 }
 0x27e   :  { %472 = vsyncpa [#allocation7], 1 }
 0x27f   :  { %473 = vsyncpa [#allocation5], 1 }

</bundles_post_ra>
